<compile_context>
chip_gen: v7x
topology: tpu7x:2x2x1
jax: 0.10.0
libtpu: 0.0.40
codegen_flags: <defaults>
</compile_context>

<pallas_src>
import jax
import jax.numpy as jnp
from jax.experimental import pallas as pl
from jax.experimental.pallas import tpu as pltpu


def _attention_kernel(hidden_ref, enc_ref, w_h_ref, w_e_ref, b_ref, v_ref,
                      out_ref, hp_ref):
    # hidden_ref: (B, D)        enc_ref: (tS, B*E2)  (row = src position, b on lane groups)
    # w_h_ref:    (D, D)        w_e_ref: (E2, D)
    # b_ref:      (1, D)        v_ref:   (1, D)
    # out_ref:    (S, B) f32    resident score accumulator / final softmax
    # hp_ref:     (B, D) f32    hoisted hidden projection
    i = pl.program_id(0)
    n_steps = pl.num_programs(0)
    B, D = hidden_ref.shape
    tS = enc_ref.shape[0]
    E2 = w_e_ref.shape[0]
    f32 = jnp.float32

    # Hoisted hidden projection: one (B, D) @ (D, D) matmul on the first step only.
    @pl.when(i == 0)
    def _():
        hp_ref[...] = jnp.dot(hidden_ref[...], w_h_ref[...],
                              preferred_element_type=f32)

    w_e = w_e_ref[...]
    bias = b_ref[...].astype(f32)     # (1, D)
    v = v_ref[...].astype(f32)        # (1, D)

    row0 = pl.multiple_of(i * tS, tS)

    # Static loop over the (small) decode batch; each iteration is a big-M
    # (tS rows) MXU matmul + VPU epilogue, no relayouts.
    for b in range(B):
        enc_b = enc_ref[:, b * E2:(b + 1) * E2]                  # (tS, E2) static lane slice
        ep = jnp.dot(enc_b, w_e, preferred_element_type=f32)     # (tS, D)  MXU
        energy = jnp.tanh(ep + hp_ref[b:b + 1, :] + bias)        # broadcast-add, f32 tanh
        c_b = jnp.sum(energy * v, axis=1, keepdims=True)         # (tS, 1)  lane reduce
        out_ref[pl.ds(row0, tS), pl.ds(b, 1)] = c_b

    # Finalize: numerically stable softmax over src_len (sublane axis).
    @pl.when(i == n_steps - 1)
    def _():
        s = out_ref[...]                                  # (S, B) f32
        m = jnp.max(s, axis=0, keepdims=True)
        e = jnp.exp(s - m)
        out_ref[...] = e / jnp.sum(e, axis=0, keepdims=True)


def _pick_tile_s(S, row_bytes, target_bytes=2 << 20, max_rows=1024):
    """Largest divisor of S that is a multiple of 8, bounded by a VMEM budget."""
    cap = min(S, max_rows, max(8, target_bytes // max(row_bytes, 1)))
    if cap >= S:
        return S
    t = (cap // 8) * 8
    while t >= 8:
        if S % t == 0:
            return t
        t -= 8
    return S  # fallback: single resident block


def attention_forward(hidden, encoder_outputs, w_attn, b_attn, v_w,
                      compute_dtype=None):
    """hidden: (B, D); encoder_outputs: (S, B, E2); returns attention weights (B, S)."""
    S, B, E2 = encoder_outputs.shape
    D = hidden.shape[1]
    assert w_attn.shape == (D, D + E2)

    # Layout plumbing only: free trailing-dim collapse, no transpose of the big tensor.
    enc2d = encoder_outputs.reshape(S, B * E2)
    # concat order in torch is (hidden, enc) -> first D input features act on hidden.
    w_h_t = jnp.transpose(w_attn[:, :D])      # (D, D)
    w_e_t = jnp.transpose(w_attn[:, D:])      # (E2, D)
    b2 = b_attn.reshape(1, D)
    v2 = v_w.reshape(1, D)

    if compute_dtype is not None:
        # bf16 MXU operands: halves encoder HBM traffic, 2x MXU rate on v6e/v7x.
        # (In a real pipeline the activations would already be bf16; the cast here
        # is demo-only.)  Accumulation stays f32 via preferred_element_type.
        enc2d = enc2d.astype(compute_dtype)
        hidden = hidden.astype(compute_dtype)
        w_h_t = w_h_t.astype(compute_dtype)
        w_e_t = w_e_t.astype(compute_dtype)

    tS = _pick_tile_s(S, row_bytes=B * E2 * enc2d.dtype.itemsize)
    grid = (S // tS,)

    scores_sb = pl.pallas_call(
        _attention_kernel,
        out_shape=jax.ShapeDtypeStruct((S, B), jnp.float32),
        grid_spec=pltpu.PrefetchScalarGridSpec(
            num_scalar_prefetch=0,
            grid=grid,
            in_specs=[
                pl.BlockSpec((B, D), lambda i: (0, 0)),          # hidden (resident)
                pl.BlockSpec((tS, B * E2), lambda i: (i, 0)),    # encoder tile (pipelined)
                pl.BlockSpec((D, D), lambda i: (0, 0)),          # W_h^T (resident)
                pl.BlockSpec((E2, D), lambda i: (0, 0)),         # W_e^T (resident)
                pl.BlockSpec((1, D), lambda i: (0, 0)),          # bias
                pl.BlockSpec((1, D), lambda i: (0, 0)),          # v weight
            ],
            out_specs=pl.BlockSpec((S, B), lambda i: (0, 0)),    # resident score accumulator
            scratch_shapes=[pltpu.VMEM((B, D), jnp.float32)],    # hoisted hidden projection
        ),
        compiler_params=pltpu.CompilerParams(
            # The src_len grid axis carries the softmax reduction -> arbitrary.
            # TODO(synk): add a 'parallel' batch axis for v7x's second TensorCore once
            # B is large enough to tile (lane blocking needs B*E2 to split on 128s).
            dimension_semantics=("arbitrary",),
            vmem_limit_bytes=32 * 1024 * 1024,
        ),
    )(hidden, enc2d, w_h_t, w_e_t, b2, v2)

    # (S, B) -> (B, S): tiny score matrix, negligible XLA transpose.
    return jnp.transpose(scores_sb)


def attention_reference(hidden, encoder_outputs, w_attn, b_attn, v_w):
    """Pure-JAX mirror of the PyTorch forward for verification."""
    S = encoder_outputs.shape[0]
    h = jnp.repeat(hidden[:, None, :], S, axis=1)               # (B, S, D)
    enc = jnp.transpose(encoder_outputs, (1, 0, 2))             # (B, S, E2)
    x = jnp.concatenate([h, enc], axis=2)                       # (B, S, D+E2)
    energy = jnp.tanh(x @ w_attn.T + b_attn)                    # (B, S, D)
    attn = (energy @ v_w.T)[..., 0]                             # (B, S)
    return jax.nn.softmax(attn, axis=1)


if __name__ == "__main__":
    enc_hidden_dim = 16
    dec_hidden_dim = 32
    batch = 2
    src_len = 8
    E2 = 2 * enc_hidden_dim
    D = dec_hidden_dim
    in_features = E2 + D

    key = jax.random.PRNGKey(0)
    k_h, k_e, k_w, k_b, k_v = jax.random.split(key, 5)

    # deterministic "PyTorch-like" parameter init (uniform +/- 1/sqrt(fan_in))
    bound_attn = 1.0 / (in_features ** 0.5)
    bound_v = 1.0 / (D ** 0.5)
    w_attn = jax.random.uniform(k_w, (D, in_features), jnp.float32, -bound_attn, bound_attn)
    b_attn = jax.random.uniform(k_b, (D,), jnp.float32, -bound_attn, bound_attn)
    v_w = jax.random.uniform(k_v, (1, D), jnp.float32, -bound_v, bound_v)

    hidden = jax.random.normal(k_h, (batch, dec_hidden_dim), jnp.float32)
    encoder_outputs = jax.random.normal(k_e, (src_len, batch, E2), jnp.float32)

    ref = attention_reference(hidden, encoder_outputs, w_attn, b_attn, v_w)

    # f32 path: matches the PyTorch reference at tight tolerance.
    out = attention_forward(hidden, encoder_outputs, w_attn, b_attn, v_w)
    out = jax.block_until_ready(out)
    assert out.shape == (batch, src_len), out.shape
    assert jnp.allclose(out, ref, rtol=1e-5, atol=1e-5), (out, ref)
    assert jnp.allclose(jnp.sum(out, axis=1), 1.0, atol=1e-5)

    # bf16 MXU-operand path (bandwidth optimization); f32 accumulation keeps the
    # softmax probabilities within a loose tolerance of the f32 reference.
    out_bf16 = attention_forward(hidden, encoder_outputs, w_attn, b_attn, v_w,
                                 compute_dtype=jnp.bfloat16)
    out_bf16 = jax.block_until_ready(out_bf16)
    assert out_bf16.shape == (batch, src_len)
    assert jnp.allclose(out_bf16, ref, rtol=5e-2, atol=5e-2)
    assert jnp.allclose(jnp.sum(out_bf16, axis=1), 1.0, atol=1e-2)

    print("KERNEL_OK")
</pallas_src>

<mosaic_0001>
module attributes {stable_mosaic.version = 11 : i64} {
  func.func @_attention_kernel(%arg0: i32, %arg1: memref<2x32xf32, #tpu.memory_space<vmem>>, %arg2: memref<8x64xf32, #tpu.memory_space<vmem>>, %arg3: memref<32x32xf32, #tpu.memory_space<vmem>>, %arg4: memref<32x32xf32, #tpu.memory_space<vmem>>, %arg5: memref<1x32xf32, #tpu.memory_space<vmem>>, %arg6: memref<1x32xf32, #tpu.memory_space<vmem>>, %arg7: memref<8x2xf32, #tpu.memory_space<vmem>>, %arg8: memref<2x32xf32, #tpu.memory_space<vmem>>) attributes {dimension_semantics = [#tpu.dimension_semantics<arbitrary>], iteration_bounds = array<i64: 1>, scalar_prefetch = 0 : i64, scratch_operands = 1 : i64, tpu.core_type = #tpu.core_type<tc>, window_params = [{pipeline_mode = #tpu.pipeline_mode<synchronous>, transform_indices = @transform_0, window_bounds = array<i64: 2, 32>}, {transform_indices = @transform_1, window_bounds = array<i64: 8, 64>}, {pipeline_mode = #tpu.pipeline_mode<synchronous>, transform_indices = @transform_2, window_bounds = array<i64: 32, 32>}, {pipeline_mode = #tpu.pipeline_mode<synchronous>, transform_indices = @transform_3, window_bounds = array<i64: 32, 32>}, {pipeline_mode = #tpu.pipeline_mode<synchronous>, transform_indices = @transform_4, window_bounds = array<i64: 1, 32>}, {pipeline_mode = #tpu.pipeline_mode<synchronous>, transform_indices = @transform_5, window_bounds = array<i64: 1, 32>}, {pipeline_mode = #tpu.pipeline_mode<synchronous>, transform_indices = @transform_6, window_bounds = array<i64: 8, 2>}]} {
    %c0_i32 = arith.constant 0 : i32
    %0 = arith.cmpi eq, %arg0, %c0_i32 : i32
    %1 = arith.extui %0 : i1 to i32
    %c0_i32_0 = arith.constant 0 : i32
    %2 = arith.cmpi ne, %1, %c0_i32_0 : i32
    scf.if %2 {
      %c0_19 = arith.constant 0 : index
      %c0_20 = arith.constant 0 : index
      %39 = vector.load %arg1[%c0_19, %c0_20] : memref<2x32xf32, #tpu.memory_space<vmem>>, vector<2x32xf32>
      %c0_21 = arith.constant 0 : index
      %c0_22 = arith.constant 0 : index
      %40 = vector.load %arg3[%c0_21, %c0_22] : memref<32x32xf32, #tpu.memory_space<vmem>>, vector<32x32xf32>
      %cst_23 = arith.constant dense<0.000000e+00> : vector<2x32xf32>
      %41 = tpu.matmul %39, %40, %cst_23 {dimension_numbers = #tpu.dot_dimension_numbers<[1], [0], [0], [1], [0, 0, 1, 1], [], []>} : vector<2x32xf32>, vector<32x32xf32>, vector<2x32xf32> -> vector<2x32xf32>
      %c0_24 = arith.constant 0 : index
      %c0_25 = arith.constant 0 : index
      %42 = vector.load %arg8[%c0_24, %c0_25] : memref<2x32xf32, #tpu.memory_space<vmem>>, vector<2x32xf32>
      tpu.vector_store %arg8[%c0_24, %c0_25], %41 {strides = array<i32>} : memref<2x32xf32, #tpu.memory_space<vmem>>, vector<2x32xf32>,
    } else {
    }
    %c0 = arith.constant 0 : index
    %c0_1 = arith.constant 0 : index
    %3 = vector.load %arg4[%c0, %c0_1] : memref<32x32xf32, #tpu.memory_space<vmem>>, vector<32x32xf32>
    %c0_2 = arith.constant 0 : index
    %c0_3 = arith.constant 0 : index
    %4 = vector.load %arg5[%c0_2, %c0_3] : memref<1x32xf32, #tpu.memory_space<vmem>>, vector<1x32xf32>
    %c0_4 = arith.constant 0 : index
    %c0_5 = arith.constant 0 : index
    %5 = vector.load %arg6[%c0_4, %c0_5] : memref<1x32xf32, #tpu.memory_space<vmem>>, vector<1x32xf32>
    %c8_i32 = arith.constant 8 : i32
    %6 = arith.muli %arg0, %c8_i32 : i32
    %7 = tpu.assume_multiple %6, 8 : i32
    %c0_6 = arith.constant 0 : index
    %c0_7 = arith.constant 0 : index
    %8 = vector.load %arg2[%c0_6, %c0_7] : memref<8x64xf32, #tpu.memory_space<vmem>>, vector<8x32xf32>
    %cst = arith.constant dense<0.000000e+00> : vector<8x32xf32>
    %9 = tpu.matmul %8, %3, %cst {dimension_numbers = #tpu.dot_dimension_numbers<[1], [0], [0], [1], [0, 0, 1, 1], [], []>} : vector<8x32xf32>, vector<32x32xf32>, vector<8x32xf32> -> vector<8x32xf32>
    %c0_8 = arith.constant 0 : index
    %c0_9 = arith.constant 0 : index
    %10 = vector.load %arg8[%c0_8, %c0_9] : memref<2x32xf32, #tpu.memory_space<vmem>>, vector<1x32xf32>
    %11 = vector.broadcast %10 : vector<1x32xf32> to vector<8x32xf32>
    %12 = arith.addf %9, %11 : vector<8x32xf32>
    %13 = vector.broadcast %4 : vector<1x32xf32> to vector<8x32xf32>
    %14 = arith.addf %12, %13 : vector<8x32xf32>
    %15 = math.tanh %14 : vector<8x32xf32>
    %16 = vector.broadcast %5 : vector<1x32xf32> to vector<8x32xf32>
    %17 = arith.mulf %15, %16 : vector<8x32xf32>
    %cst_10 = arith.constant dense<0.000000e+00> : vector<8xf32>
    %18 = vector.multi_reduction <add>, %17, %cst_10 [1] : vector<8x32xf32> to vector<8xf32>
    %19 = vector.shape_cast %18 : vector<8xf32> to vector<8x1xf32>
    %20 = arith.index_cast %7 : i32 to index
    %c0_11 = arith.constant 0 : index
    %21 = vector.load %arg7[%20, %c0_11] : memref<8x2xf32, #tpu.memory_space<vmem>>, vector<8x1xf32>
    tpu.vector_store %arg7[%20, %c0_11], %19 {strides = array<i32>} : memref<8x2xf32, #tpu.memory_space<vmem>>, vector<8x1xf32>,
    %c0_12 = arith.constant 0 : index
    %c32 = arith.constant 32 : index
    %22 = vector.load %arg2[%c0_12, %c32] : memref<8x64xf32, #tpu.memory_space<vmem>>, vector<8x32xf32>
    %cst_13 = arith.constant dense<0.000000e+00> : vector<8x32xf32>
    %23 = tpu.matmul %22, %3, %cst_13 {dimension_numbers = #tpu.dot_dimension_numbers<[1], [0], [0], [1], [0, 0, 1, 1], [], []>} : vector<8x32xf32>, vector<32x32xf32>, vector<8x32xf32> -> vector<8x32xf32>
    %c1 = arith.constant 1 : index
    %c0_14 = arith.constant 0 : index
    %24 = vector.load %arg8[%c1, %c0_14] : memref<2x32xf32, #tpu.memory_space<vmem>>, vector<1x32xf32>
    %25 = vector.broadcast %24 : vector<1x32xf32> to vector<8x32xf32>
    %26 = arith.addf %23, %25 : vector<8x32xf32>
    %27 = vector.broadcast %4 : vector<1x32xf32> to vector<8x32xf32>
    %28 = arith.addf %26, %27 : vector<8x32xf32>
    %29 = math.tanh %28 : vector<8x32xf32>
    %30 = vector.broadcast %5 : vector<1x32xf32> to vector<8x32xf32>
    %31 = arith.mulf %29, %30 : vector<8x32xf32>
    %cst_15 = arith.constant dense<0.000000e+00> : vector<8xf32>
    %32 = vector.multi_reduction <add>, %31, %cst_15 [1] : vector<8x32xf32> to vector<8xf32>
    %33 = vector.shape_cast %32 : vector<8xf32> to vector<8x1xf32>
    %34 = arith.index_cast %7 : i32 to index
    %c1_16 = arith.constant 1 : index
    %35 = vector.load %arg7[%34, %c1_16] : memref<8x2xf32, #tpu.memory_space<vmem>>, vector<8x1xf32>
    tpu.vector_store %arg7[%34, %c1_16], %33 {strides = array<i32>} : memref<8x2xf32, #tpu.memory_space<vmem>>, vector<8x1xf32>,
    %c0_i32_17 = arith.constant 0 : i32
    %36 = arith.cmpi eq, %arg0, %c0_i32_17 : i32
    %37 = arith.extui %36 : i1 to i32
    %c0_i32_18 = arith.constant 0 : i32
    %38 = arith.cmpi ne, %37, %c0_i32_18 : i32
    scf.if %38 {
      %c0_19 = arith.constant 0 : index
      %c0_20 = arith.constant 0 : index
      %39 = vector.load %arg7[%c0_19, %c0_20] : memref<8x2xf32, #tpu.memory_space<vmem>>, vector<8x2xf32>
      %cst_21 = arith.constant dense<0xFF800000> : vector<2xf32>
      %40 = vector.multi_reduction <maximumf>, %39, %cst_21 [0] : vector<8x2xf32> to vector<2xf32>
      %41 = vector.shape_cast %40 : vector<2xf32> to vector<1x2xf32>
      %42 = vector.broadcast %41 : vector<1x2xf32> to vector<8x2xf32>
      %43 = arith.subf %39, %42 : vector<8x2xf32>
      %44 = math.exp %43 : vector<8x2xf32>
      %cst_22 = arith.constant dense<0.000000e+00> : vector<2xf32>
      %45 = vector.multi_reduction <add>, %44, %cst_22 [0] : vector<8x2xf32> to vector<2xf32>
      %46 = vector.shape_cast %45 : vector<2xf32> to vector<1x2xf32>
      %47 = vector.broadcast %46 : vector<1x2xf32> to vector<8x2xf32>
      %48 = arith.divf %44, %47 : vector<8x2xf32>
      %c0_23 = arith.constant 0 : index
      %c0_24 = arith.constant 0 : index
      %49 = vector.load %arg7[%c0_23, %c0_24] : memref<8x2xf32, #tpu.memory_space<vmem>>, vector<8x2xf32>
      tpu.vector_store %arg7[%c0_23, %c0_24], %48 {strides = array<i32>} : memref<8x2xf32, #tpu.memory_space<vmem>>, vector<8x2xf32>,
    } else {
    }
    return
  }
  func.func @transform_0(%arg0: i32) -> (i32, i32) {
    %c0_i32 = arith.constant 0 : i32
    %c0_i32_0 = arith.constant 0 : i32
    %c0_i32_1 = arith.constant 0 : i32
    return %c0_i32, %c0_i32_0 : i32, i32
  }
  func.func @transform_1(%arg0: i32) -> (i32, i32) {
    %c0_i32 = arith.constant 0 : i32
    %c0_i32_0 = arith.constant 0 : i32
    return %arg0, %c0_i32 : i32, i32
  }
  func.func @transform_2(%arg0: i32) -> (i32, i32) {
    %c0_i32 = arith.constant 0 : i32
    %c0_i32_0 = arith.constant 0 : i32
    %c0_i32_1 = arith.constant 0 : i32
    return %c0_i32, %c0_i32_0 : i32, i32
  }
  func.func @transform_3(%arg0: i32) -> (i32, i32) {
    %c0_i32 = arith.constant 0 : i32
    %c0_i32_0 = arith.constant 0 : i32
    %c0_i32_1 = arith.constant 0 : i32
    return %c0_i32, %c0_i32_0 : i32, i32
  }
  func.func @transform_4(%arg0: i32) -> (i32, i32) {
    %c0_i32 = arith.constant 0 : i32
    %c0_i32_0 = arith.constant 0 : i32
    %c0_i32_1 = arith.constant 0 : i32
    return %c0_i32, %c0_i32_0 : i32, i32
  }
  func.func @transform_5(%arg0: i32) -> (i32, i32) {
    %c0_i32 = arith.constant 0 : i32
    %c0_i32_0 = arith.constant 0 : i32
    %c0_i32_1 = arith.constant 0 : i32
    return %c0_i32, %c0_i32_0 : i32, i32
  }
  func.func @transform_6(%arg0: i32) -> (i32, i32) {
    %c0_i32 = arith.constant 0 : i32
    %c0_i32_0 = arith.constant 0 : i32
    %c0_i32_1 = arith.constant 0 : i32
    return %c0_i32, %c0_i32_0 : i32, i32
  }
}

</mosaic_0001>

<bundles_post_ra>
// kernel: tpu_custom_call.1
= control target key start
LH: loop header
LB: loop body
LE: loop exit
PB: predicated region body
PF: predicated region fallthrough
CT: control target
= control target key end

     0   :  { %11 = vsyncpa [#allocation4], 0  ;;  %s695_s0 = inlined_call_operand.hbm [shape: f32[2,32], index: 0, kind: input, shape index: {}]   ;;  %s696_s1 = inlined_call_operand.hbm [shape: f32[8,64], index: 1, kind: input, shape index: {}]   ;;  %s697_s2 = inlined_call_operand.hbm [shape: f32[32,32], index: 2, kind: input, shape index: {}]   ;;  %s698_s3 = inlined_call_operand.hbm [shape: f32[32,32], index: 3, kind: input, shape index: {}]   ;;  %s699_s4 = inlined_call_operand.vmem [shape: f32[1,32], index: 4, kind: input, shape index: {}]   ;;  %s700_s5 = inlined_call_operand.vmem [shape: f32[1,32], index: 5, kind: input, shape index: {}]   ;;  %s701_s6 = inlined_call_operand.vmem [shape: f32[8,2], index: 6, kind: output, shape index: {}]  }
   0x1   :  { %12 = vsyncpa [#allocation6], 0 }
   0x2   :  { %13 = vsyncpa [#allocation9], 0  ;;  %s573_s21 = smov [#allocation5]   ;;  %s574_s23 = smov [#allocation3]  }
   0x3   :  { %s30_s22 = sshll.u32 %s573_s21, 4  ;;  %s20_s24 = sshll.u32 %s574_s23, 4  ;;  %s31_s22 = int_to_ptr.vmem [resolvable:$true] %s30_s22  ;;  %s21_s24 = int_to_ptr.vmem [resolvable:$true] %s20_s24 }
   0x4   :  { %s479_s27 = scalar_lea.hbm %s696_s1, 128 }
   0x5   :  { %p480_p0 = scmp.ne.s32.totalorder %s696_s1, %s479_s27  ;;  %p483_p1 = scmp.lt.u32.totalorder %s479_s27, %s696_s1 }
   0x7   :  { %p485_p2 = pnand %p483_p1, %p480_p0 }
   0x9   :  { %488 = shalt.err (!%p485_p2)
}
   0xa   :  { %s489_s8 = scalar_lea.vmem %s31_s22, 128  ;;  %p494_p4 = scmp.lt.s32.totalorder %s31_s22, %s31_s22 }
   0xb   :  { %p490_p3 = scmp.ne.s32.totalorder %s31_s22, %s489_s8  ;;  %p495_p5 = scmp.lt.s32.totalorder %s489_s8, %s489_s8 }
   0xd   :  { %p496_p6 = por %p495_p5, %p494_p4 }
   0xf   :  { %p497_p7 = pnand %p496_p6, %p490_p3 }
  0x11   :  { %500 = shalt.err (!%p497_p7)
}
  0x12   :  { %33 = dma.hbm_to_vmem [thread:$0]  %s696_s1, 128, %s31_s22, [#allocation6]  }
  0x13   :  { %s501_s13 = scalar_lea.hbm %s695_s0, 32 }
  0x14   :  { %p502_p8 = scmp.ne.s32.totalorder %s695_s0, %s501_s13  ;;  %p505_p9 = scmp.lt.u32.totalorder %s501_s13, %s695_s0 }
  0x16   :  { %p507_p10 = pnand %p505_p9, %p502_p8 }
  0x18   :  { %510 = shalt.err (!%p507_p10)
}
  0x19   :  { %s511_s18 = scalar_lea.vmem %s21_s24, 32  ;;  %p516_p12 = scmp.lt.s32.totalorder %s21_s24, %s21_s24 }
  0x1a   :  { %p512_p11 = scmp.ne.s32.totalorder %s21_s24, %s511_s18  ;;  %p517_p13 = scmp.lt.s32.totalorder %s511_s18, %s511_s18 }
  0x1c   :  { %p518_p0 = por %p517_p13, %p516_p12 }
  0x1e   :  { %p519_p1 = pnand %p518_p0, %p512_p11 }
  0x20   :  { %522 = shalt.err (!%p519_p1)
}
  0x21   :  { %23 = dma.hbm_to_vmem [thread:$0]  %s695_s0, 32, %s21_s24, [#allocation4]  }
  0x22   :  { %s575_s20 = smov [#allocation7]   ;;  %s523_s25 = scalar_lea.hbm %s697_s2, 512 }
  0x23   :  { %s39_s21 = sshll.u32 %s575_s20, 4  ;;  %p524_p2 = scmp.ne.s32.totalorder %s697_s2, %s523_s25  ;;  %s40_s21 = int_to_ptr.vmem [resolvable:$true] %s39_s21 }
  0x24   :  { %p527_p3 = scmp.lt.u32.totalorder %s523_s25, %s697_s2 }
  0x26   :  { %p529_p4 = pnand %p527_p3, %p524_p2 }
  0x28   :  { %532 = shalt.err (!%p529_p4)
}
  0x29   :  { %s533_s30 = scalar_lea.vmem %s40_s21, 512  ;;  %p538_p6 = scmp.lt.s32.totalorder %s40_s21, %s40_s21 }
  0x2a   :  { %p534_p5 = scmp.ne.s32.totalorder %s40_s21, %s533_s30  ;;  %p539_p7 = scmp.lt.s32.totalorder %s533_s30, %s533_s30 }
  0x2c   :  { %p540_p8 = por %p539_p7, %p538_p6 }
  0x2e   :  { %p541_p9 = pnand %p540_p8, %p534_p5 }
  0x30   :  { %544 = shalt.err (!%p541_p9)
}
  0x31   :  { %s576_s0 = smov 128   ;;  %s577_s24 = smov 8  }
  0x32   :  { %45 = dma.hbm_to_vmem [thread:$0]  %s697_s2, 512, %s40_s21, [#allocation6], %s576_s0, %s576_s0, %s577_s24  }
  0x33   :  { %s578_s9 = smov [#allocation8]   ;;  %s545_s13 = scalar_lea.hbm %s698_s3, 512 }
  0x34   :  { %s51_s10 = sshll.u32 %s578_s9, 4  ;;  %p546_p10 = scmp.ne.s32.totalorder %s698_s3, %s545_s13  ;;  %s52_s10 = int_to_ptr.vmem [resolvable:$true] %s51_s10 }
  0x35   :  { %p549_p11 = scmp.lt.u32.totalorder %s545_s13, %s698_s3 }
  0x37   :  { %p551_p12 = pnand %p549_p11, %p546_p10 }
  0x39   :  { %554 = shalt.err (!%p551_p12)
}
  0x3a   :  { %s555_s18 = scalar_lea.vmem %s52_s10, 512  ;;  %p560_p0 = scmp.lt.s32.totalorder %s52_s10, %s52_s10 }
  0x3b   :  { %p556_p13 = scmp.ne.s32.totalorder %s52_s10, %s555_s18  ;;  %p561_p1 = scmp.lt.s32.totalorder %s555_s18, %s555_s18 }
  0x3d   :  { %p562_p2 = por %p561_p1, %p560_p0 }
  0x3f   :  { %p563_p3 = pnand %p562_p2, %p556_p13 }
  0x41   :  { %566 = shalt.err (!%p563_p3)
}
  0x42   :  { %57 = dma.hbm_to_vmem [thread:$0]  %s698_s3, 512, %s52_s10, [#allocation9], %s576_s0, %s576_s0, %s577_s24  }
  0x43   :  { %567 = dma.done.wait [#allocation4], 32  }
  0x44   :  { %568 = vsyncadd [#allocation4], 4294967264 }
  0x45   :  { %569 = dma.done.wait [#allocation6], 640  }
  0x46   :  { %570 = vsyncadd [#allocation6], 4294966656 }
  0x47   :  { %571 = dma.done.wait [#allocation9], 512  }
  0x48   :  { %572 = vsyncadd [#allocation9], 4294966784  ;;  %v579_v0 = vmov 0.0|0.0   ;;  %vm580_vm0 = vmmov 0   ;;  %v581_v1 = vmov 0.0   ;;  %v267_v2 = vld [vmem:[#allocation5] sm:$0xff] }
  0x49   :  { %443 = vmatprep.subr.bf16.mxu0 %v579_v0  ;;  %418 = vmatprep.mubr.msk.f32.mxu0 %vm580_vm0, %v581_v1  ;;  %v79_v3 = vld [vmem:[#allocation7] sm:$0xff]  ;;  %v80_v4 = vld [vmem:[#allocation7 + $0x8] sm:$0xff]  ;;  %s582_s19 = smov 96   ;;  %v81_v6 = vld [vmem:[#allocation7 + $0x10] sm:$0xff]  ;;  %vm83_vm1 = vcmask 261120   ;;  %vm157_vm2 = vcmask 254976  }
  0x4a   :  { %449 = vmatprep.subr.bf16.mxu1 %v579_v0  ;;  %429 = vmatprep.mubr.msk.f32.mxu1 %vm580_vm0, %v581_v1  ;;  %v444_v5 = vpack.c.bf16 %v80_v4, %v79_v3  ;;  %v82_v7 = vld [vmem:[#allocation7 + $0x18] sm:$0xff]  ;;  %v159_v8 = vld [vmem:[#allocation8] sm:$0xff]  ;;  %v160_v9 = vld [vmem:[#allocation8 + $0x8] sm:$0xff]  ;;  %vm265_vm3 = vcmask 7168   ;;  %vm354_vm4 = vcmask 15368   ;;  %vm360_vm5 = vcmask 15360  }
  0x4b   :  { %274 = vrot.lane.b32.xlu0 %v267_v2, %s582_s19  ;;  %v161_v10 = vld [vmem:[#allocation8 + $0x10] sm:$0xff]  ;;  %v447_v11 = vpack.c.bf16 %v82_v7, %v81_v6  ;;  %v450_v12 = vpack.c.bf16 %v160_v9, %v159_v8  ;;  %v162_v13 = vld [vmem:[#allocation8 + $0x18] sm:$0xff] }
  0x4c   :  { %445 = vmatpush3.bf16.msra.mxu0 %v444_v5  ;;  %v453_v14 = vpack.c.bf16 %v162_v13, %v161_v10  ;;  %v78_v15 = vld [vmem:[#allocation3] sm:$0x3]  ;;  %v391_v21 = vld [vmem:[%s699_s4] ss:$0 sm:$0xff] }
  0x4d   :  { %446 = vmatprep.subr.bf16.mxu0 %v579_v0  ;;  %451 = vmatpush3.bf16.msra.mxu1 %v450_v12  ;;  %v392_v25 = vld [vmem:[%s700_s5] ss:$0 sm:$0xff] }
  0x4e   :  { %452 = vmatprep.subr.bf16.mxu1 %v579_v0 }
  0x50   :  { %448 = vmatpush3.bf16.msra.mxu0 %v447_v11 }
  0x51   :  { %455 = vmatprep.subr.bf16.mxu0 %v579_v0  ;;  %454 = vmatpush3.bf16.msra.mxu1 %v453_v14 }
  0x53   :  { %419 = vmatmul.mubr.msk.f32.vlgmr.msra.gmra.mrb[0].mxu0 %vm83_vm1, %v78_v15 }
  0x54   :  { %457 = vmatpush3.bf16.msra.mxu0 %v450_v12  ;;  %440 = vmatprep.mubr.msk.f32.mxu0 %vm580_vm0, %v581_v1 }
  0x55   :  { %458 = vmatprep.subr.bf16.mxu0 %v579_v0  ;;  %430 = vmatmul.mubr.msk.f32.vlgmr.msra.gmra.mrb[0].mxu1 %vm83_vm1, %v267_v2 }
  0x58   :  { %460 = vmatpush3.bf16.msra.mxu0 %v453_v14 }
  0xbd   :  { %v275_v16 = vpop.permute.xlu0 %274 }
  0xbe   :  { %441 = vmatmul.mubr.msk.f32.vlgmr.msra.gmra.mrb[2].mxu0 %vm83_vm1, %v275_v16 }
 0x126   :  { %v153_v17 = vpop.f32.mrb[0].mxu0 }
 0x127   :  { %158 = vst.msk [vmem:[#allocation2] sm:$0x3] %vm157_vm2, %v153_v17  ;;  %v420_v18 = vpop.f32.mrb[1].mxu0 }
 0x128   :  { %v242_v19 = vpop.f32.mrb[0].mxu1 }
 0x129   :  { %v431_v20 = vpop.f32.mrb[1].mxu1 }
 0x12e   :  { %v389_v22 = vld [vmem:[#allocation2] ss:$0 sm:$0xff]  ;;  %v393_v29 = vld [vmem:[#allocation2 + $0x1] ss:$0 sm:$0xff] }
 0x12f   :  { %v243_v23 = vadd.f32 %v389_v22, %v242_v19 }
 0x131   :  { %v252_v24 = vadd.f32 %v391_v21, %v243_v23 }
 0x133   :  { %471 = vtanh.f32 %v252_v24 }
 0x13d   :  { %v472_v26 = vpop.eup %471 }
 0x13e   :  { %v260_v27 = vmul.f32 %v472_v26, %v392_v25 }
 0x140   :  { %v261_v28 = vsel %vm83_vm1, %v260_v27, 0.0 }
 0x141   :  { %262 = vadd.xlane.f32.xlu0 %v261_v28 }
 0x191   :  { %v344_v30 = vpop.f32.mrb[2].mxu0 }
 0x192   :  { %v345_v31 = vadd.f32 %v393_v29, %v344_v30  ;;  %v442_v32 = vpop.f32.mrb[3].mxu0 }
 0x194   :  { %v348_v33 = vadd.f32 %v391_v21, %v345_v31 }
 0x196   :  { %473 = vtanh.f32 %v348_v33 }
 0x1a0   :  { %v474_v34 = vpop.eup %473 }
 0x1a1   :  { %v350_v35 = vmul.f32 %v474_v34, %v392_v25 }
 0x1a3   :  { %v351_v36 = vsel %vm83_vm1, %v350_v35, 0.0 }
 0x1a4   :  { %352 = vadd.xlane.f32.xlu1 %v351_v36 }
 0x1ce   :  { %v263_v37 = vpop.xlane.xlu0 %262 }
 0x1cf   :  { %266 = vst.msk [vmem:[%s701_s6] sm:$0xff] %vm265_vm3, %v263_v37 }
 0x231   :  { %v353_v38 = vpop.xlane.xlu1 %352 }
 0x232   :  { %355 = vst.msk [vmem:[%s701_s6] sm:$0xff] %vm354_vm4, %v353_v38 }
 0x239   :  { %v359_v39 = vld [vmem:[%s701_s6] sm:$0xff] }
 0x23a   :  { %v361_v40 = vsel %vm360_vm5, %v359_v39, -inf }
 0x23b   :  { %v362_v41 = vrot.slane %v361_v40, 4 }
 0x23d   :  { %v363_v42 = vmax.f32 %v361_v40, %v362_v41 }
 0x23f   :  { %v364_v43 = vrot.slane %v363_v42, 2 }
 0x241   :  { %v365_v44 = vmax.f32 %v363_v42, %v364_v43 }
 0x243   :  { %v366_v45 = vrot.slane %v365_v44, 1 }
 0x245   :  { %v367_v46 = vmax.f32 %v365_v44, %v366_v45 }
 0x247   :  { %v368_v47 = vsub.f32 %v359_v39, %v367_v46 }
 0x249   :  { %v369_v48 = vmul.f32 1.442695, %v368_v47 }
 0x24b   :  { %475 = vpow2.f32 %v369_v48 }
 0x255   :  { %v476_v49 = vpop.eup %475 }
 0x256   :  { %v371_v50 = vsel %vm360_vm5, %v476_v49, 0.0 }
 0x257   :  { %v372_v51 = vrot.slane %v371_v50, 4 }
 0x259   :  { %v373_v52 = vadd.f32 %v372_v51, %v371_v50 }
 0x25b   :  { %v374_v53 = vrot.slane %v373_v52, 2 }
 0x25d   :  { %v375_v54 = vadd.f32 %v374_v53, %v373_v52 }
 0x25f   :  { %v376_v55 = vrot.slane %v375_v54, 1 }
 0x261   :  { %v377_v56 = vadd.f32 %v376_v55, %v375_v54 }
 0x263   :  { %477 = vrcp.f32 %v377_v56 }
 0x26d   :  { %v478_v57 = vpop.eup %477 }
 0x26e   :  { %v379_v58 = vmul.f32 %v478_v57, %v476_v49 }
 0x270   :  { %380 = vst.msk [vmem:[%s701_s6] sm:$0xff] %vm360_vm5, %v379_v58 }
 0x271   :  { %385 = vsyncpa [#allocation4], 1 }
 0x272   :  { %386 = vsyncpa [#allocation6], 1 }
 0x273   :  { %387 = vsyncpa [#allocation9], 1 }

</bundles_post_ra>
